<compile_context>
chip_gen: v7x
topology: tpu7x:2x2x1
jax: 0.10.0
libtpu: 0.0.40
codegen_flags: <defaults>
</compile_context>

<pallas_src>
import jax
import jax.numpy as jnp
from jax.experimental import pallas as pl
from jax.experimental.pallas import tpu as pltpu


def react_kernel(x_ref, out_ref):
    # x_ref:   (Bb, T, C)   block of node embeddings (batch-major, CLS at t=0)
    # out_ref: (Bb, T, 2C)  [node_emb | CLS emb broadcast along T]
    x = x_ref[...]
    cls = jnp.broadcast_to(x[:, 0:1, :], x.shape)        # CLS token per batch row
    out_ref[...] = jnp.concatenate([x, cls], axis=-1)    # single full-tile store


def _pick_batch_block(B, T, C, dtype, target_step_bytes=4 << 20):
    """Batch rows per grid step: big enough to amortize per-step pipeline
    overhead, small enough that the double-buffered in+out working set fits
    comfortably in scoped VMEM on v5e / v6e / v7x."""
    bytes_per_row = T * 3 * C * jnp.dtype(dtype).itemsize   # in (C) + out (2C)
    bb = max(1, target_step_bytes // max(bytes_per_row, 1))
    bb = int(min(bb, B))
    if B > 1:
        # Keep at least 2 grid steps so the "parallel" axis can shard across
        # v7x's two TensorCores.
        bb = min(bb, -(-B // 2))
    return max(1, bb)


def get_reaction_node_embedding(node_embedding):
    """node_embedding: (B, T, C) -> (B, T, 2C), matching the PyTorch method."""
    B, T, C = node_embedding.shape
    bb = _pick_batch_block(B, T, C, node_embedding.dtype)
    grid_b = pl.cdiv(B, bb)
    return pl.pallas_call(
        react_kernel,
        out_shape=jax.ShapeDtypeStruct((B, T, 2 * C), node_embedding.dtype),
        grid_spec=pltpu.PrefetchScalarGridSpec(
            num_scalar_prefetch=0,
            grid=(grid_b,),
            in_specs=[pl.BlockSpec((bb, T, C), lambda b: (b, 0, 0))],
            out_specs=pl.BlockSpec((bb, T, 2 * C), lambda b: (b, 0, 0)),
        ),
        compiler_params=pltpu.CompilerParams(
            dimension_semantics=("parallel",),
            vmem_limit_bytes=32 << 20,
        ),
    )(node_embedding)


@jax.jit
def graphormer_react_forward(inner_state_last):
    """Forward of GraphormerReact given the encoder's last inner state.

    inner_state_last: (T, B, C) — layout produced by the graph encoder
    (sequence-major), matching `inner_states[-1]` in the PyTorch module.
    """
    # TODO(synk): the GraphormerGraphEncoder (`self.graph_encoder`) is an
    # external module passed into __init__; its forward is not defined in this
    # module, so we consume its output directly.
    # TODO(synk): next perf steps — fuse the (T,B,C)->(B,T,C) transpose into
    # the kernel (input block (T,Bb,C) + pltpu.einshape("tbc->btc")) to drop
    # one HBM round trip, and ideally fuse the concat/broadcast into the
    # downstream consumer of the (B,T,2C) tensor instead of materializing it.
    x = jnp.transpose(inner_state_last, (1, 0, 2))       # matches .transpose(0, 1)
    return get_reaction_node_embedding(x)


if __name__ == "__main__":
    key = jax.random.PRNGKey(0)
    T, B, C = 8, 2, 32                                    # seq=8 (CLS + 7 nodes), batch=2, hidden=32
    inner_state = jax.random.normal(key, (T, B, C), dtype=jnp.float32)

    out = graphormer_react_forward(inner_state)
    out = jax.block_until_ready(out)

    # pure-JAX reference check
    x_ref = jnp.transpose(inner_state, (1, 0, 2))
    ref = jnp.concatenate(
        [x_ref, jnp.broadcast_to(x_ref[:, :1, :], x_ref.shape)], axis=2)
    assert out.shape == (B, T, 2 * C), out.shape
    assert out.dtype == inner_state.dtype
    assert jnp.allclose(out, ref), "mismatch vs reference"

    print("KERNEL_OK")
</pallas_src>

<mosaic_0001>
module attributes {stable_mosaic.version = 11 : i64} {
  func.func @react_kernel(%arg0: i32, %arg1: memref<1x8x32xf32, #tpu.memory_space<vmem>>, %arg2: memref<1x8x64xf32, #tpu.memory_space<vmem>>) attributes {dimension_semantics = [#tpu.dimension_semantics<parallel>], iteration_bounds = array<i64: 2>, scalar_prefetch = 0 : i64, scratch_operands = 0 : i64, tpu.core_type = #tpu.core_type<tc>, window_params = [{transform_indices = @transform_0, window_bounds = array<i64: 1, 8, 32>}, {transform_indices = @transform_1, window_bounds = array<i64: 1, 8, 64>}]} {
    %c0 = arith.constant 0 : index
    %c0_0 = arith.constant 0 : index
    %c0_1 = arith.constant 0 : index
    %0 = vector.load %arg1[%c0, %c0_0, %c0_1] : memref<1x8x32xf32, #tpu.memory_space<vmem>>, vector<1x8x32xf32>
    %1 = vector.extract_strided_slice %0 {offsets = [0, 0, 0], sizes = [1, 1, 32], strides = [1, 1, 1]} : vector<1x8x32xf32> to vector<1x1x32xf32>
    %2 = vector.shape_cast %1 : vector<1x1x32xf32> to vector<1x1x32xf32>
    %3 = vector.broadcast %2 : vector<1x1x32xf32> to vector<1x8x32xf32>
    %4 = tpu.concatenate %0, %3 in 2 : vector<1x8x32xf32>, vector<1x8x32xf32> -> vector<1x8x64xf32>
    %c0_2 = arith.constant 0 : index
    %c0_3 = arith.constant 0 : index
    %c0_4 = arith.constant 0 : index
    %5 = vector.load %arg2[%c0_2, %c0_3, %c0_4] : memref<1x8x64xf32, #tpu.memory_space<vmem>>, vector<1x8x64xf32>
    tpu.vector_store %arg2[%c0_2, %c0_3, %c0_4], %4 {strides = array<i32>} : memref<1x8x64xf32, #tpu.memory_space<vmem>>, vector<1x8x64xf32>,
    return
  }
  func.func @transform_0(%arg0: i32) -> (i32, i32, i32) {
    %c0_i32 = arith.constant 0 : i32
    %c0_i32_0 = arith.constant 0 : i32
    %c0_i32_1 = arith.constant 0 : i32
    return %arg0, %c0_i32, %c0_i32_0 : i32, i32, i32
  }
  func.func @transform_1(%arg0: i32) -> (i32, i32, i32) {
    %c0_i32 = arith.constant 0 : i32
    %c0_i32_0 = arith.constant 0 : i32
    %c0_i32_1 = arith.constant 0 : i32
    return %arg0, %c0_i32, %c0_i32_0 : i32, i32, i32
  }
}

</mosaic_0001>

<bundles_post_ra>
// kernel: graphormer_react_forward.1
= control target key start
LH: loop header
LB: loop body
LE: loop exit
PB: predicated region body
PF: predicated region fallthrough
CT: control target
= control target key end

     0   :  { %6 = vsyncpa [#allocation3], 0  ;;  %s424_s0 = inlined_call_operand.vmem [shape: f32[2,8,32], index: 0, kind: input, shape index: {}]   ;;  %s425_s1 = inlined_call_operand.hbm [shape: f32[2,8,64], index: 1, kind: output, shape index: {}]  }
   0x1   :  { %8 = vsyncpa [#allocation3 + $0x1], 0  ;;  %s324_s6 = smov 0   ;;  %s326_s7 = smov 0  }
   0x2   :  { %s328_s8 = smov 0   ;;  %s330_s9 = smov 0  }
   0x3 LB: > { %s345_s10 = sadd.s32 4294967295, %s310_s9   ;;  %s198_s11 = sadd.s32 4294967294, %s310_s9   ;;  %s310_s9 = sphi %s330_s9, %s431_s9   ;;  %s306_s8 = sphi %s328_s8, %s430_s8   ;;  %s302_s7 = sphi %s326_s7, %s429_s7   ;;  %s298_s6 = sphi %s324_s6, %s428_s6  }
   0x4   : > { %s349_s12 = sadd.s32 1, %s310_s9   ;;  %s47_s13 = sadd.s32 1, %s306_s8 }
   0x5   : > { %s44_s14 = ssub.s32 %s310_s9, %s349_s12  ;;  %p57_p0 = scmp.ne.s32.totalorder %s306_s8, %s302_s7 }
   0x6   : > { %p45_p1 = scmp.eq.s32.totalorder %s44_s14, 0  ;;  %p58_p2 = scmp.eq.s32.totalorder %s345_s10, 1 }
   0x7   : > { %p63_p3 = scmp.ne.s32.totalorder %s302_s7, %s298_s6  ;;  %p64_p4 = scmp.eq.s32.totalorder %s198_s11, 1 }
   0x8   : > { %s360_s15 = scalar_select %p45_p1, %s306_s8, %s47_s13  }
   0x9   : > { %p362_p5 = por %p58_p2, %p57_p0  ;;  %p366_p6 = por %p64_p4, %p63_p3 }
   0xa   : > { %p201_p7 = scmp.ge.s32.totalorder %s310_s9, 1  ;;  %p89_p8 = scmp.lt.s32.totalorder %s310_s9, 3 }
   0xc   : > { %p90_p9 = pnand %p201_p7, %p89_p8 }
   0xd   : > { %p108_p10 = scmp.lt.s32.totalorder (!%p90_p9), %s345_s10, 1  ;;  %v113_v0 = vlaneseq (!%p90_p9)  ;;  %s312_s23 = smov (!%p90_p9), 32   ;;  %vm121_vm0 = vcmask (!%p90_p9), 261120   ;;  %vm123_vm1 = vcmask (!%p90_p9), 523264  }
   0xe   : > { %93 = sbr.rel (%p90_p9) target bundleno = 158 (0x9e), region = 24  ;;  %s105_s24 = sand.u32 (!%p90_p9), 1, %s302_s7  }
   0xf   : > { %v114_v1 = vshrl.u32 (!%p90_p9), %v113_v0, 7  ;;  %s202_s25 = sshll.u32 (!%p90_p9), %s105_s24, 3  ;;  %s205_s26 = sshll.u32 (!%p90_p9), %s345_s10, 7 }
  0x10   : > { %s107_s27 = scalar_lea.vmem (!%p90_p9), [#allocation2], %s202_s25  ;;  %s382_s2 = scalar_lea.hbm (!%p90_p9), %s425_s1, %s205_s26 }
  0x11   : > { %v115_v2 = vsub.s32 (!%p90_p9), 0, %v114_v1  ;;  %s139_s28 = sshll.u32 (!%p90_p9), %s107_s27, 4  ;;  %s126_s3 = scalar_lea.sflag (!%p90_p9), [#allocation3], %s105_s24  ;;  %s384_s28 = int_to_ptr.vmem [resolvable:$true] %s139_s28 }
  0x12   : > { %s248_s4 = scalar_lea.vmem (!%p90_p9), %s384_s28, 128  ;;  %s313_s5 = smov (!%p90_p9), [#allocation2]  }
  0x13   : > { %p249_p11 = scmp.ne.s32.totalorder (!%p90_p9), %s384_s28, %s248_s4 }
  0x15   : > { %s109_s18 = scalar_select %p108_p10, %s345_s10, 1 }
  0x16   : > { %p250_p12 = pnand %p249_p11, %p362_p5  ;;  %s252_s10 = sshll.u32 %s313_s5, 4  ;;  %s253_s10 = int_to_ptr.vmem [resolvable:$false] %s252_s10 }
  0x17   : > { %s203_s19 = sshll.u32 %s109_s18, 3  ;;  %s254_s11 = scalar_lea.vmem %s253_s10, 256 }
  0x18   : > { %s111_s22 = scalar_lea.vmem %s424_s0, %s203_s19  ;;  %p251_p13 = pneg %p250_p12 }
  0x19   : > { %v112_v3 = vld [vmem:[%s111_s22] sm:$0xff]  ;;  %p255_p0 = scmp.lt.s32.totalorder %s384_s28, %s253_s10  ;;  %p256_p1 = scmp.lt.s32.totalorder %s254_s11, %s248_s4 }
  0x1a   : > { %v116_v4 = vrot.slane %v112_v3, %v115_v2 }
  0x1b   : > { %p257_p2 = por %p256_p1, %p255_p0 }
  0x1c   : > { %118 = vrot.lane.b32.xlu0 %v116_v4, %s312_s23 }
  0x1d   : > { %p258_p3 = pnand %p257_p2, %p251_p13 }
  0x8e   : > { %v119_v5 = vpop.permute.xlu0 %118 }
  0x8f   : > { %v122_v6 = vsel %vm121_vm0, %v112_v3, %v119_v5 }
  0x90   : > { %124 = vst.msk [vmem:[%s107_s27] sm:$0xff] %vm123_vm1, %v122_v6 }
  0x91   : > { %261 = shalt.err (!%p258_p3)
}
  0x92   : > { %s262_s13 = scalar_lea.hbm %s382_s2, 128  ;;  %s266_s19 = scalar_lea.hbm %s425_s1, 256 }
  0x93   : > { %p263_p4 = scmp.ne.s32.totalorder %s382_s2, %s262_s13  ;;  %p267_p9 = scmp.lt.u32.totalorder %s382_s2, %s425_s1 }
  0x94   : > { %p268_p10 = scmp.lt.u32.totalorder %s266_s19, %s262_s13  ;;  %p270_p12 = scmp.lt.u32.totalorder %s262_s13, %s382_s2 }
  0x95   : > { %p264_p7 = pnand %p263_p4, %p362_p5 }
  0x96   : > { %p269_p11 = por %p268_p10, %p267_p9 }
  0x97   : > { %p265_p8 = pneg %p264_p7 }
  0x98   : > { %p271_p13 = por %p270_p12, %p269_p11 }
  0x9a   : > { %p272_p0 = pnand %p271_p13, %p265_p8 }
  0x9c   : > { %275 = shalt.err (!%p272_p0)
}
  0x9d   : > { %208 = dma.vmem_to_hbm [thread:$0]  (%p362_p5), %s384_s28, 128, %s382_s2, %s126_s3  }
  0x9e PF: > { %p214_p1 = scmp.ge.s32.totalorder %s310_s9, 2  ;;  %s151_s22 = sand.u32 1, %s298_s6  }
  0x9f   : > { %s152_s23 = scalar_lea.sflag [#allocation3], %s151_s22 }
  0xa0   : > { %p211_p2 = pnand %p214_p1, %p366_p6 }
  0xa2   : > { %293 = dma.done.wait (!%p211_p2), %s152_s23, 128  }
  0xa3   : > { %295 = vsyncadd (!%p211_p2), %s152_s23, 4294967168  ;;  %p11_p3 = scmp.ge.s32.totalorder %s349_s12, 4   ;;  %s428_s6 = smov %s302_s7 }
  0xa4   : > { %s429_s7 = smov %s306_s8  ;;  %s430_s8 = smov %s360_s15 }
  0xa5   : > { %s431_s9 = smov %s349_s12  ;;  %13 = sbr.rel (!%p11_p3) target bundleno = 3 (0x3), region = 59 }
  0xac   :  { %157 = vsyncpa [#allocation3], 1 }
  0xad   :  { %159 = vsyncpa [#allocation3 + $0x1], 1 }

</bundles_post_ra>
